<compile_context>
chip_gen: v7x
topology: tpu7x:2x2x1
jax: 0.10.0
libtpu: 0.0.40
codegen_flags: <defaults>
</compile_context>

<pallas_src>
import functools

import jax
import jax.numpy as jnp
from jax.experimental import pallas as pl
from jax.experimental.pallas import tpu as pltpu


def _swish_kernel(x_ref, o_ref, *, compute_dtype):
    xc = x_ref[...].astype(compute_dtype)
    # sigmoid(x) = 0.5*tanh(0.5*x) + 0.5 : one EUP op, no VALU-hungry divide.
    sig = 0.5 * jnp.tanh(0.5 * xc) + 0.5
    o_ref[...] = (xc * sig).astype(o_ref.dtype)


_WIDTHS = (2048, 1024, 512, 256, 128)


def _pick_width(n):
    """Widest lane-dense width (multiple of 128) that divides n exactly."""
    for w in _WIDTHS:
        if n % w == 0:
            return w
    return None


def _swish_2d(x_flat, n, width, dtype, compute_dtype, target_block_bytes, donate):
    itemsize = jnp.dtype(dtype).itemsize
    # Sublane multiple for packed dtypes: f32 -> 8, bf16/f16 -> 16.
    sub = max(8, 32 // max(1, itemsize))
    rows = n // width
    x2d = x_flat.reshape(rows, width)  # metadata-only for contiguous arrays

    # ~target_block_bytes per input tile; tile_rows is a multiple of `sub`
    # (or equals the full row extent, which Pallas also accepts).
    tile_rows = (target_block_bytes // (width * itemsize)) // sub * sub
    tile_rows = max(sub, tile_rows)
    if rows > sub:
        # Guarantee >= 2 grid steps so v7x's two TensorCores both get work and
        # read/compute/write pipeline across steps. Ragged last block is masked.
        cap = max(sub, (rows // 2) // sub * sub)
        tile_rows = min(tile_rows, cap)
    tile_rows = min(tile_rows, rows)

    grid = (pl.cdiv(rows, tile_rows),)

    kernel = functools.partial(_swish_kernel, compute_dtype=compute_dtype)
    out = pl.pallas_call(
        kernel,
        out_shape=jax.ShapeDtypeStruct((rows, width), dtype),
        grid_spec=pltpu.PrefetchScalarGridSpec(
            num_scalar_prefetch=0,
            grid=grid,
            in_specs=[pl.BlockSpec((tile_rows, width), lambda i: (i, 0))],
            out_specs=pl.BlockSpec((tile_rows, width), lambda i: (i, 0)),
        ),
        compiler_params=pltpu.CompilerParams(
            dimension_semantics=("parallel",),
            # Double-buffered in+out ~4 MiB tiles fit with headroom; v5e's
            # scoped-VMEM default is only 16 MiB so make the limit explicit.
            vmem_limit_bytes=32 * 1024 * 1024,
        ),
        input_output_aliases=({0: 0} if donate else {}),
    )(x2d)
    return out.reshape(-1)


def swish(x, *, target_block_bytes=4 * 1024 * 1024, bf16_compute=True, donate=False):
    """Elementwise Swish (x * sigmoid(x)) via Pallas, for floating dtypes."""
    dtype = x.dtype
    if not jnp.issubdtype(dtype, jnp.floating):
        raise TypeError(f"swish expects a floating dtype, got {dtype}")
    orig_shape = x.shape
    n = x.size
    if n == 0:
        return x

    compute_dtype = (
        jnp.bfloat16 if (bf16_compute and dtype == jnp.bfloat16) else jnp.float32
    )
    x_flat = jnp.ravel(x)

    width = _pick_width(n)
    if width is not None:
        out_flat = _swish_2d(
            x_flat, n, width, dtype, compute_dtype, target_block_bytes, donate
        )
    else:
        # n is not a multiple of 128: run the aligned prefix through the kernel
        # and the (<128-element) tail through plain XLA. No full-tensor pad/slice.
        main_n = (n // 128) * 128
        parts = []
        if main_n:
            w = _pick_width(main_n)
            parts.append(
                _swish_2d(x_flat[:main_n], main_n, w, dtype, compute_dtype,
                          target_block_bytes, donate)
            )
        tail = x_flat[main_n:].astype(compute_dtype)
        parts.append((tail * jax.nn.sigmoid(tail)).astype(dtype))
        out_flat = jnp.concatenate(parts) if len(parts) > 1 else parts[0]

    return out_flat.reshape(orig_shape)


if __name__ == "__main__":
    key = jax.random.PRNGKey(0)
    k1, k2, k3 = jax.random.split(key, 3)

    # 1) Typical aligned f32 conv activation (NCHW-style).
    x = jax.random.normal(k1, (2, 4, 16, 16), dtype=jnp.float32)
    y = swish(x)
    jax.block_until_ready(y)
    y_ref = x * jax.nn.sigmoid(x)
    assert y.shape == x.shape and y.dtype == x.dtype
    assert jnp.allclose(y, y_ref, atol=2e-5, rtol=2e-5)

    # 2) Ragged size (1000 elements, not a multiple of 128): prefix kernel + XLA tail.
    xr = jax.random.normal(k2, (5, 200), dtype=jnp.float32)
    yr = swish(xr)
    jax.block_until_ready(yr)
    yr_ref = xr * jax.nn.sigmoid(xr)
    assert yr.shape == xr.shape and yr.dtype == xr.dtype
    assert jnp.allclose(yr, yr_ref, atol=2e-5, rtol=2e-5)

    # 3) bf16 I/O with bf16 compute (looser tolerance: bf16 intermediates).
    xb = jax.random.normal(k3, (4, 8, 32), dtype=jnp.bfloat16)
    yb = swish(xb)
    jax.block_until_ready(yb)
    xb_f = xb.astype(jnp.float32)
    yb_ref = xb_f * jax.nn.sigmoid(xb_f)
    assert yb.shape == xb.shape and yb.dtype == jnp.bfloat16
    assert jnp.allclose(yb.astype(jnp.float32), yb_ref, atol=5e-2, rtol=5e-2)

    print("KERNEL_OK")
</pallas_src>

<mosaic_0001>
module attributes {stable_mosaic.version = 11 : i64} {
  func.func @_swish_kernel(%arg0: i32, %arg1: memref<1x2048xf32, #tpu.memory_space<vmem>>, %arg2: memref<1x2048xf32, #tpu.memory_space<vmem>>) attributes {dimension_semantics = [#tpu.dimension_semantics<parallel>], iteration_bounds = array<i64: 1>, scalar_prefetch = 0 : i64, scratch_operands = 0 : i64, tpu.core_type = #tpu.core_type<tc>, window_params = [{transform_indices = @transform_0, window_bounds = array<i64: 1, 2048>}, {transform_indices = @transform_1, window_bounds = array<i64: 1, 2048>}]} {
    %c0 = arith.constant 0 : index
    %c0_0 = arith.constant 0 : index
    %0 = vector.load %arg1[%c0, %c0_0] : memref<1x2048xf32, #tpu.memory_space<vmem>>, vector<1x2048xf32>
    %cst = arith.constant 5.000000e-01 : f32
    %1 = vector.broadcast %cst : f32 to vector<1x2048xf32>
    %2 = arith.mulf %1, %0 : vector<1x2048xf32>
    %3 = math.tanh %2 : vector<1x2048xf32>
    %cst_1 = arith.constant 5.000000e-01 : f32
    %4 = vector.broadcast %cst_1 : f32 to vector<1x2048xf32>
    %5 = arith.mulf %4, %3 : vector<1x2048xf32>
    %cst_2 = arith.constant 5.000000e-01 : f32
    %6 = vector.broadcast %cst_2 : f32 to vector<1x2048xf32>
    %7 = arith.addf %5, %6 : vector<1x2048xf32>
    %8 = arith.mulf %0, %7 : vector<1x2048xf32>
    %c0_3 = arith.constant 0 : index
    %c0_4 = arith.constant 0 : index
    %9 = vector.load %arg2[%c0_3, %c0_4] : memref<1x2048xf32, #tpu.memory_space<vmem>>, vector<1x2048xf32>
    tpu.vector_store %arg2[%c0_3, %c0_4], %8 {strides = array<i32>} : memref<1x2048xf32, #tpu.memory_space<vmem>>, vector<1x2048xf32>,
    return
  }
  func.func @transform_0(%arg0: i32) -> (i32, i32) {
    %c0_i32 = arith.constant 0 : i32
    %c0_i32_0 = arith.constant 0 : i32
    return %arg0, %c0_i32 : i32, i32
  }
  func.func @transform_1(%arg0: i32) -> (i32, i32) {
    %c0_i32 = arith.constant 0 : i32
    %c0_i32_0 = arith.constant 0 : i32
    return %arg0, %c0_i32 : i32, i32
  }
}

</mosaic_0001>

<bundles_post_ra>
// kernel: tpu_custom_call.1
= control target key start
LH: loop header
LB: loop body
LE: loop exit
PB: predicated region body
PF: predicated region fallthrough
CT: control target
= control target key end

     0   :  { %6 = vsyncpa [#allocation3], 0  ;;  %s140_s0 = inlined_call_operand.hbm [shape: f32[1,2048], index: 0, kind: input, shape index: {}]   ;;  %s141_s1 = inlined_call_operand.hbm [shape: f32[1,2048], index: 1, kind: output, shape index: {}]  }
   0x1   :  { %7 = vsyncpa [#allocation4], 0  ;;  %s104_s6 = smov [#allocation2]   ;;  %s56_s10 = scalar_lea.hbm %s140_s0, 256 }
   0x2   :  { %s14_s7 = sshll.u32 %s104_s6, 4  ;;  %p57_p0 = scmp.ne.s32.totalorder %s140_s0, %s56_s10  ;;  %s15_s7 = int_to_ptr.vmem [resolvable:$true] %s14_s7 }
   0x3   :  { %p60_p1 = scmp.lt.u32.totalorder %s56_s10, %s140_s0 }
   0x5   :  { %p62_p2 = pnand %p60_p1, %p57_p0 }
   0x7   :  { %65 = shalt.err (!%p62_p2)
}
   0x8   :  { %s66_s15 = scalar_lea.vmem %s15_s7, 256  ;;  %p71_p4 = scmp.lt.s32.totalorder %s15_s7, %s15_s7 }
   0x9   :  { %p67_p3 = scmp.ne.s32.totalorder %s15_s7, %s66_s15  ;;  %p72_p5 = scmp.lt.s32.totalorder %s66_s15, %s66_s15 }
   0xb   :  { %p73_p6 = por %p72_p5, %p71_p4 }
   0xd   :  { %p74_p7 = pnand %p73_p6, %p67_p3 }
   0xf   :  { %77 = shalt.err (!%p74_p7)
}
  0x10   :  { %17 = dma.hbm_to_vmem [thread:$0]  %s140_s0, 256, %s15_s7, [#allocation3]  }
  0x11   :  { %100 = dma.done.wait [#allocation3], 256  }
  0x12   :  { %101 = vsyncadd [#allocation3], 4294967040  ;;  %v21_v0 = vld [vmem:[#allocation2] sm:$0xff]  ;;  %v22_v1 = vld [vmem:[#allocation2 + $0x8] sm:$0xff]  ;;  %s105_s18 = smov [#allocation5]  }
  0x13   :  { %v23_v2 = vmul.f32 0.5, %v21_v0  ;;  %v24_v3 = vmul.f32 0.5, %v22_v1  ;;  %s41_s19 = sshll.u32 %s105_s18, 4  ;;  %s42_s19 = int_to_ptr.vmem [resolvable:$true] %s41_s19 }
  0x14   :  { %s78_s0 = scalar_lea.vmem %s42_s19, 256  ;;  %p83_p9 = scmp.lt.s32.totalorder %s42_s19, %s42_s19 }
  0x15   :  { %52 = vtanh.f32 %v23_v2  ;;  %p79_p8 = scmp.ne.s32.totalorder %s42_s19, %s78_s0  ;;  %p84_p10 = scmp.lt.s32.totalorder %s78_s0, %s78_s0 }
  0x16   :  { %54 = vtanh.f32 %v24_v3 }
  0x17   :  { %p85_p11 = por %p84_p10, %p83_p9 }
  0x19   :  { %p86_p12 = pnand %p85_p11, %p79_p8 }
  0x1f   :  { %v53_v4 = vpop.eup %52 }
  0x20   :  { %v55_v5 = vpop.eup %54  ;;  %v27_v6 = vmul.f32 0.5, %v53_v4 }
  0x21   :  { %v28_v7 = vmul.f32 0.5, %v55_v5 }
  0x22   :  { %v29_v8 = vadd.f32 0.5, %v27_v6 }
  0x23   :  { %v30_v9 = vadd.f32 0.5, %v28_v7 }
  0x24   :  { %v31_v10 = vmul.f32 %v29_v8, %v21_v0 }
  0x25   :  { %v32_v11 = vmul.f32 %v30_v9, %v22_v1 }
  0x26   :  { %33 = vst [vmem:[#allocation5] sm:$0xff] %v31_v10 }
  0x27   :  { %34 = vst [vmem:[#allocation5 + $0x8] sm:$0xff] %v32_v11 }
  0x28   :  { %89 = shalt.err (!%p86_p12)
}
  0x29   :  { %s90_s22 = scalar_lea.hbm %s141_s1, 256 }
  0x2a   :  { %p91_p13 = scmp.ne.s32.totalorder %s141_s1, %s90_s22  ;;  %p94_p0 = scmp.lt.u32.totalorder %s90_s22, %s141_s1 }
  0x2c   :  { %p96_p1 = pnand %p94_p0, %p91_p13 }
  0x2e   :  { %99 = shalt.err (!%p96_p1)
}
  0x2f   :  { %44 = dma.vmem_to_hbm [thread:$0]  %s42_s19, 256, %s141_s1, [#allocation4]  }
  0x30   :  { %102 = dma.done.wait [#allocation4], 256  }
  0x31   :  { %103 = vsyncadd [#allocation4], 4294967040 }
  0x32   :  { %48 = vsyncpa [#allocation3], 1 }
  0x33   :  { %49 = vsyncpa [#allocation4], 1 }

</bundles_post_ra>
